<compile_context>
chip_gen: v7x
topology: tpu7x:2x2x1
jax: 0.10.0
libtpu: 0.0.40
codegen_flags: <defaults>
</compile_context>

<pallas_src>
import functools

import jax
import jax.numpy as jnp
from jax import lax
from jax.experimental import pallas as pl
from jax.experimental.pallas import tpu as pltpu

LANE = 128  # TPU lane width; each of k/q/v occupies one full lane tile in the slab.


def head_kernel(x_ref, w_ref, o_ref, *, head_size):
    # Per grid step (one batch element):
    #   x_ref: (T, C)        f32  activations (cast to bf16 in-kernel, on the VPU)
    #   w_ref: (C, 3*LANE)   bf16 [Wk.T | Wq.T | Wv.T], each zero-padded H -> LANE
    #   o_ref: (T, LANE)     f32  lane-dense output slab (cols >= head_size are zero)
    x = x_ref[...].astype(jnp.bfloat16)
    w = w_ref[...]

    # Fused QKV projection: one MXU matmul, f32 accumulation.
    qkv = jnp.dot(x, w, preferred_element_type=jnp.float32)          # (T, 3*LANE)

    # 128-lane-aligned slices: free (no XLU relayout before downstream matmuls).
    k = qkv[:, 0 * LANE:1 * LANE]
    q = qkv[:, 1 * LANE:2 * LANE]
    v = qkv[:, 2 * LANE:3 * LANE]

    # Scale q (a (T, LANE) tensor) instead of the (T, T) logits: less VPU work.
    scale = jnp.float32(head_size) ** jnp.float32(-0.5)
    q = q * scale

    # Attention logits: contract over the padded head dim (zero lanes contribute 0).
    logits = lax.dot_general(
        q.astype(jnp.bfloat16), k.astype(jnp.bfloat16),
        dimension_numbers=(((1,), (1,)), ((), ())),
        preferred_element_type=jnp.float32)                           # (T, T)

    # Causal mask (col <= row). The diagonal is always valid, so no row is fully
    # masked and exp(-inf - max) cannot produce NaN.
    T = logits.shape[0]
    row = lax.broadcasted_iota(jnp.int32, (T, T), 0)
    col = lax.broadcasted_iota(jnp.int32, (T, T), 1)
    logits = jnp.where(col <= row, logits, jnp.float32(-jnp.inf))

    # Numerically-stable softmax, all in f32.
    m = jnp.max(logits, axis=-1, keepdims=True)
    e = jnp.exp(logits - m)
    denom = jnp.sum(e, axis=-1, keepdims=True)
    attn = e * pl.reciprocal(denom, approx=True)   # EUP slot; ~1e-3 rel error, fine at atol=1e-2

    # TODO(synk): dropout(attn) omitted (identity in eval mode).

    # Lane-dense (T, 128) store (unmasked vst); padded v lanes keep cols >= H at zero.
    out = jnp.dot(attn.astype(jnp.bfloat16), v.astype(jnp.bfloat16),
                  preferred_element_type=jnp.float32)                 # (T, LANE)
    o_ref[...] = out.astype(o_ref.dtype)


def make_qkv_slab(wk_t, wq_t, wv_t):
    """Build the fused, lane-aligned (C, 3*128) bf16 weight slab ONCE at init.

    Each w*_t is the already-transposed nn.Linear weight of shape (C, H);
    k occupies lanes [0,128), q lanes [128,256), v lanes [256,384)."""
    C, H = wk_t.shape
    assert H <= LANE, "single head must fit inside one 128-lane tile"

    def pad(w_t):
        return jnp.pad(w_t, ((0, 0), (0, LANE - H)))

    return jnp.concatenate([pad(wk_t), pad(wq_t), pad(wv_t)], axis=1).astype(jnp.bfloat16)


def head_forward(x, w_qkv, head_size):
    """x: (B, T, C) f32; w_qkv: (C, 3*128) bf16 slab from make_qkv_slab."""
    B, T, C = x.shape
    H = head_size

    kernel = functools.partial(head_kernel, head_size=H)

    cost = pl.CostEstimate(
        flops=B * (2 * T * C * (3 * H) + 2 * T * T * H + 2 * T * T * H),
        transcendentals=B * T * T,
        bytes_accessed=x.size * 4 + w_qkv.size * 2 + B * T * LANE * 4,
    )

    grid_spec = pltpu.PrefetchScalarGridSpec(
        num_scalar_prefetch=0,
        grid=(B,),  # batch on a parallel grid axis (shardable across v7x's 2 TCs)
        in_specs=[
            pl.BlockSpec((None, T, C), lambda b: (b, 0, 0)),       # one batch per step
            pl.BlockSpec((C, 3 * LANE), lambda b: (0, 0)),         # shared weight slab
        ],
        out_specs=pl.BlockSpec((None, T, LANE), lambda b: (b, 0, 0)),
    )

    out = pl.pallas_call(
        kernel,
        out_shape=jax.ShapeDtypeStruct((B, T, LANE), jnp.float32),
        grid_spec=grid_spec,
        compiler_params=pltpu.CompilerParams(
            dimension_semantics=("parallel",),
        ),
        cost_estimate=cost,
    )(x, w_qkv)

    # Drop the zero-padded lanes: final output is (B, T, H), matching the module.
    return out[:, :, :H].astype(x.dtype)


def head_reference(x, wk_t, wq_t, wv_t):
    """Pure-JAX reference mirroring the kernel's mixed precision (bf16 matmuls, f32 softmax)."""
    xb = x.astype(jnp.bfloat16)

    def proj(wt):
        return jnp.einsum('btc,ch->bth', xb, wt.astype(jnp.bfloat16),
                          preferred_element_type=jnp.float32)

    k = proj(wk_t)
    q = proj(wq_t)
    v = proj(wv_t)
    H = k.shape[-1]
    logits = jnp.einsum('bqh,bkh->bqk', q.astype(jnp.bfloat16), k.astype(jnp.bfloat16),
                        preferred_element_type=jnp.float32) * (H ** -0.5)
    T = x.shape[1]
    tril = jnp.tril(jnp.ones((T, T)))
    logits = jnp.where(tril == 0, -jnp.inf, logits)
    attn = jax.nn.softmax(logits, axis=-1)
    out = jnp.einsum('bqk,bkh->bqh', attn.astype(jnp.bfloat16), v.astype(jnp.bfloat16),
                     preferred_element_type=jnp.float32)
    return out.astype(x.dtype)


if __name__ == "__main__":
    # Hyperparameters implied by the module (kept small).
    batch = 2
    block_size = 8     # T
    num_embed = 32     # C
    head_size = 16     # H

    key = jax.random.PRNGKey(0)
    kx, kk, kq, kv = jax.random.split(key, 4)

    x = jax.random.normal(kx, (batch, block_size, num_embed), dtype=jnp.float32)
    # nn.Linear(num_embed, head_size, bias=False) weight shape: (head_size, num_embed)
    Wk = jax.random.normal(kk, (head_size, num_embed), dtype=jnp.float32) * 0.02
    Wq = jax.random.normal(kq, (head_size, num_embed), dtype=jnp.float32) * 0.02
    Wv = jax.random.normal(kv, (head_size, num_embed), dtype=jnp.float32) * 0.02

    # Fused / lane-padded weight slab, built once at init (hoisted out of forward).
    w_qkv = jax.block_until_ready(make_qkv_slab(Wk.T, Wq.T, Wv.T))

    out = head_forward(x, w_qkv, head_size)
    out = jax.block_until_ready(out)

    ref = head_reference(x, Wk.T, Wq.T, Wv.T)
    assert out.shape == (batch, block_size, head_size)
    assert jnp.allclose(out, ref, atol=1e-2, rtol=1e-2), "mismatch vs reference"

    print("KERNEL_OK")
</pallas_src>

<mosaic_0001>
module attributes {stable_mosaic.version = 11 : i64} {
  func.func @head_kernel(%arg0: i32, %arg1: memref<1x8x32xf32, #tpu.memory_space<vmem>>, %arg2: memref<32x384xbf16, #tpu.memory_space<vmem>>, %arg3: memref<1x8x128xf32, #tpu.memory_space<vmem>>) attributes {dimension_semantics = [#tpu.dimension_semantics<parallel>], iteration_bounds = array<i64: 2>, scalar_prefetch = 0 : i64, scratch_operands = 0 : i64, tpu.core_type = #tpu.core_type<tc>, window_params = [{transform_indices = @transform_0, window_bounds = array<i64: 1, 8, 32>}, {pipeline_mode = #tpu.pipeline_mode<synchronous>, transform_indices = @transform_1, window_bounds = array<i64: 32, 384>}, {transform_indices = @transform_2, window_bounds = array<i64: 1, 8, 128>}]} {
    %c0 = arith.constant 0 : index
    %c0_0 = arith.constant 0 : index
    %c0_1 = arith.constant 0 : index
    %0 = vector.load %arg1[%c0, %c0_0, %c0_1] : memref<1x8x32xf32, #tpu.memory_space<vmem>>, vector<1x8x32xf32>
    %1 = vector.shape_cast %0 : vector<1x8x32xf32> to vector<8x32xf32>
    %2 = arith.truncf %1 : vector<8x32xf32> to vector<8x32xbf16>
    %c0_2 = arith.constant 0 : index
    %c0_3 = arith.constant 0 : index
    %3 = vector.load %arg2[%c0_2, %c0_3] : memref<32x384xbf16, #tpu.memory_space<vmem>>, vector<32x384xbf16>
    %cst = arith.constant dense<0.000000e+00> : vector<8x384xf32>
    %4 = tpu.matmul %2, %3, %cst {dimension_numbers = #tpu.dot_dimension_numbers<[1], [0], [0], [1], [0, 0, 1, 1], [], []>} : vector<8x32xbf16>, vector<32x384xbf16>, vector<8x384xf32> -> vector<8x384xf32>
    %5 = vector.extract_strided_slice %4 {offsets = [0, 0], sizes = [8, 128], strides = [1, 1]} : vector<8x384xf32> to vector<8x128xf32>
    %6 = vector.extract_strided_slice %4 {offsets = [0, 128], sizes = [8, 128], strides = [1, 1]} : vector<8x384xf32> to vector<8x128xf32>
    %7 = vector.extract_strided_slice %4 {offsets = [0, 256], sizes = [8, 128], strides = [1, 1]} : vector<8x384xf32> to vector<8x128xf32>
    %cst_4 = arith.constant 1.600000e+01 : f32
    %cst_5 = arith.constant -5.000000e-01 : f32
    %8 = math.powf %cst_4, %cst_5 : f32
    %9 = vector.broadcast %8 : f32 to vector<8x128xf32>
    %10 = arith.mulf %6, %9 : vector<8x128xf32>
    %11 = arith.truncf %10 : vector<8x128xf32> to vector<8x128xbf16>
    %12 = arith.truncf %5 : vector<8x128xf32> to vector<8x128xbf16>
    %cst_6 = arith.constant dense<0.000000e+00> : vector<8x8xf32>
    %13 = tpu.matmul %11, %12, %cst_6 {dimension_numbers = #tpu.dot_dimension_numbers<[1], [1], [0], [0], [0, 0, 1, 0], [], []>} : vector<8x128xbf16>, vector<8x128xbf16>, vector<8x8xf32> -> vector<8x8xf32>
    %14 = tpu.iota {dimensions = array<i32: 0>} : vector<8x8xi32>
    %15 = tpu.iota {dimensions = array<i32: 1>} : vector<8x8xi32>
    %16 = arith.cmpi sle, %15, %14 : vector<8x8xi32>
    %cst_7 = arith.constant 0xFF800000 : f32
    %17 = vector.broadcast %cst_7 : f32 to vector<8x8xf32>
    %18 = arith.select %16, %13, %17 : vector<8x8xi1>, vector<8x8xf32>
    %cst_8 = arith.constant dense<0xFF800000> : vector<8xf32>
    %19 = vector.multi_reduction <maximumf>, %18, %cst_8 [1] : vector<8x8xf32> to vector<8xf32>
    %20 = vector.shape_cast %19 : vector<8xf32> to vector<8x1xf32>
    %21 = vector.broadcast %20 : vector<8x1xf32> to vector<8x8xf32>
    %22 = arith.subf %18, %21 : vector<8x8xf32>
    %23 = math.exp %22 : vector<8x8xf32>
    %cst_9 = arith.constant dense<0.000000e+00> : vector<8xf32>
    %24 = vector.multi_reduction <add>, %23, %cst_9 [1] : vector<8x8xf32> to vector<8xf32>
    %25 = vector.shape_cast %24 : vector<8xf32> to vector<8x1xf32>
    %26 = tpu.reciprocal %25 {approx = true} : vector<8x1xf32> -> vector<8x1xf32>
    %27 = vector.broadcast %26 : vector<8x1xf32> to vector<8x8xf32>
    %28 = arith.mulf %23, %27 : vector<8x8xf32>
    %29 = arith.truncf %28 : vector<8x8xf32> to vector<8x8xbf16>
    %30 = arith.truncf %7 : vector<8x128xf32> to vector<8x128xbf16>
    %cst_10 = arith.constant dense<0.000000e+00> : vector<8x128xf32>
    %31 = tpu.matmul %29, %30, %cst_10 {dimension_numbers = #tpu.dot_dimension_numbers<[1], [0], [0], [1], [0, 0, 1, 1], [], []>} : vector<8x8xbf16>, vector<8x128xbf16>, vector<8x128xf32> -> vector<8x128xf32>
    %c0_11 = arith.constant 0 : index
    %c0_12 = arith.constant 0 : index
    %c0_13 = arith.constant 0 : index
    %32 = vector.load %arg3[%c0_11, %c0_12, %c0_13] : memref<1x8x128xf32, #tpu.memory_space<vmem>>, vector<1x8x128xf32>
    %33 = vector.shape_cast %32 : vector<1x8x128xf32> to vector<8x128xf32>
    %34 = vector.shape_cast %31 : vector<8x128xf32> to vector<1x8x128xf32>
    tpu.vector_store %arg3[%c0_11, %c0_12, %c0_13], %34 {strides = array<i32>} : memref<1x8x128xf32, #tpu.memory_space<vmem>>, vector<1x8x128xf32>,
    return
  }
  func.func @transform_0(%arg0: i32) -> (i32, i32, i32) {
    %c0_i32 = arith.constant 0 : i32
    %c0_i32_0 = arith.constant 0 : i32
    %c0_i32_1 = arith.constant 0 : i32
    return %arg0, %c0_i32, %c0_i32_0 : i32, i32, i32
  }
  func.func @transform_1(%arg0: i32) -> (i32, i32) {
    %c0_i32 = arith.constant 0 : i32
    %c0_i32_0 = arith.constant 0 : i32
    %c0_i32_1 = arith.constant 0 : i32
    return %c0_i32, %c0_i32_0 : i32, i32
  }
  func.func @transform_2(%arg0: i32) -> (i32, i32, i32) {
    %c0_i32 = arith.constant 0 : i32
    %c0_i32_0 = arith.constant 0 : i32
    %c0_i32_1 = arith.constant 0 : i32
    return %arg0, %c0_i32, %c0_i32_0 : i32, i32, i32
  }
}

</mosaic_0001>

<bundles_post_ra>
// kernel: tpu_custom_call.1
= control target key start
LH: loop header
LB: loop body
LE: loop exit
PB: predicated region body
PF: predicated region fallthrough
CT: control target
= control target key end

     0   :  { %7 = vsyncpa [#allocation3], 0  ;;  %s992_s0 = inlined_call_operand.hbm [shape: f32[2,8,32], index: 0, kind: input, shape index: {}]   ;;  %s993_s1 = inlined_call_operand.hbm [shape: bf16[32,384], index: 1, kind: input, shape index: {}]   ;;  %s994_s2 = inlined_call_operand.hbm [shape: f32[2,8,128], index: 2, kind: output, shape index: {}]  }
   0x1   :  { %9 = vsyncpa [#allocation3 + $0x1], 0 }
   0x2   :  { %10 = vsyncpa [#allocation6], 0 }
   0x3   :  { %11 = vsyncpa [#allocation4], 0 }
   0x4   :  { %13 = vsyncpa [#allocation4 + $0x1], 0  ;;  %s784_s9 = smov 0   ;;  %s786_s10 = smov 0  }
   0x5   :  { %s788_s11 = smov 0   ;;  %s790_s12 = smov 0  }
   0x6 LB: > { %s805_s13 = sadd.s32 4294967295, %s759_s12   ;;  %s507_s14 = sadd.s32 4294967294, %s759_s12   ;;  %s759_s12 = sphi %s790_s12, %s1014_s12   ;;  %s755_s11 = sphi %s788_s11, %s1013_s11   ;;  %s751_s10 = sphi %s786_s10, %s1012_s10   ;;  %s747_s9 = sphi %s784_s9, %s1011_s9  }
   0x7   : > { %p39_p0 = scmp.ne.s32.totalorder %s751_s10, %s747_s9  ;;  %p995_p1 = scmp.eq.s32.totalorder %s805_s13, 0 }
   0x8   : > { %p90_p3 = scmp.eq.s32.totalorder %s507_s14, 1  ;;  %p508_p5 = scmp.ge.s32.totalorder %s759_s12, 1 }
   0x9   : > { %p814_p4 = por %p995_p1, %p39_p0  ;;  %p97_p7 = scmp.lt.s32.totalorder %s759_s12, 3 }
   0xa   : > { %p819_p6 = por %p90_p3, %p39_p0  ;;  %s761_s18 = smov [#allocation5]  }
   0xb   : > { %s998_s15 = scalar_select %p814_p4, 1, 0 }
   0xc   : > { %s999_s16 = scalar_select %p819_p6, 1, 0 }
   0xd   : > { %p824_p8 = pnand %p508_p5, %p97_p7  ;;  %s109_s19 = sshll.u32 %s761_s18, 4  ;;  %s828_s19 = int_to_ptr.vmem [resolvable:$true] %s109_s19 }
   0xe   : > { %s840_s21 = sadd.s32 1, %s759_s12   ;;  %s26_s22 = sadd.s32 1, %s755_s11 }
   0xf   : > { %s1000_s17 = scalar_select %p824_p8, 1, 0 }
  0x10   : > { %p565_p9 = pneg %p824_p8  ;;  %s23_s23 = ssub.s32 %s759_s12, %s840_s21 }
  0x11   : > { %s631_s26 = scalar_lea.hbm %s993_s1, 768 }
  0x12   : > { %p835_p11 = pnand %p565_p9, %p995_p1  ;;  %p632_p12 = scmp.ne.s32.totalorder %s993_s1, %s631_s26 }
  0x13   : > { %p638_p5 = scmp.lt.u32.totalorder %s631_s26, %s993_s1 }
  0x14   : > { %p633_p13 = pneg %p835_p11 }
  0x16   : > { %p634_p0 = pnand %p633_p13, %p632_p12 }
  0x18   : > { %p635_p3 = pneg %p634_p0 }
  0x1a   : > { %p640_p7 = pnand %p638_p5, %p635_p3 }
  0x1c   : > { %643 = shalt.err (!%p640_p7)
}
  0x1d   : > { %s644_s3 = scalar_lea.vmem %s828_s19, 768  ;;  %p652_p2 = scmp.lt.s32.totalorder %s828_s19, %s828_s19 }
  0x1e   : > { %p645_p9 = scmp.ne.s32.totalorder %s828_s19, %s644_s3  ;;  %p653_p6 = scmp.lt.s32.totalorder %s644_s3, %s644_s3 }
  0x20   : > { %p647_p10 = pnand %p645_p9, %p633_p13  ;;  %p654_p4 = por %p653_p6, %p652_p2 }
  0x22   : > { %p648_p1 = pneg %p647_p10 }
  0x24   : > { %p655_p8 = pnand %p654_p4, %p648_p1 }
  0x26   : > { %658 = shalt.err (!%p655_p8)
}
  0x27   : > { %s762_s4 = smov 192   ;;  %s763_s5 = smov 12  }
  0x28   : > { %568 = dma.hbm_to_vmem [thread:$0]  (!%p835_p11), %s993_s1, 768, %s828_s19, [#allocation6], %s762_s4, %s762_s4, %s763_s5  }
  0x29   : > { %p24_p2 = scmp.eq.s32.totalorder %s23_s23, 0  ;;  %p33_p1 = scmp.ne.s32.totalorder %s755_s11, %s751_s10 }
  0x2a   : > { %p34_p4 = scmp.eq.s32.totalorder %s759_s12, 0  ;;  %p578_p6 = scmp.lt.s32.totalorder %s759_s12, 2 }
  0x2b   : > { %s871_s8 = scalar_select %p24_p2, %s755_s11, %s26_s22  }
  0x2c   : > { %p35_p8 = por %p34_p4, %p33_p1  ;;  %p1002_p10 = scmp.eq.s32.totalorder %s805_s13, 1 }
  0x2d   : > { %s123_s18 = sand.u32 1, %s755_s11   ;;  %s512_s24 = sshll.u32 %s759_s12, 7 }
  0x2e   : > { %p875_p12 = por %p1002_p10, %p33_p1  ;;  %s511_s25 = sshll.u32 %s123_s18, 3 }
  0x2f   : > { %s884_s27 = scalar_lea.hbm %s992_s0, %s512_s24  ;;  %s127_s19 = scalar_lea.vmem [#allocation2], %s511_s25 }
  0x30   : > { %s134_s22 = sshll.u32 %s127_s19, 4  ;;  %p886_p11 = pnand %p578_p6, %p35_p8  ;;  %s890_s22 = int_to_ptr.vmem [resolvable:$true] %s134_s22 }
  0x31   : > { %s124_s28 = scalar_lea.sflag [#allocation3], %s123_s18  ;;  %s659_s29 = scalar_lea.hbm %s884_s27, 128 }
  0x32   : > { %p660_p13 = scmp.ne.s32.totalorder %s884_s27, %s659_s29  ;;  %p661_p0 = pneg %p886_p11 }
  0x33   : > { %s664_s4 = scalar_lea.hbm %s992_s0, 256  ;;  %p665_p7 = scmp.lt.u32.totalorder %s884_s27, %s992_s0 }
  0x34   : > { %p662_p3 = pnand %p661_p0, %p660_p13  ;;  %p666_p9 = scmp.lt.u32.totalorder %s664_s4, %s659_s29 }
  0x35   : > { %p668_p1 = scmp.lt.u32.totalorder %s659_s29, %s884_s27 }
  0x36   : > { %p663_p5 = pneg %p662_p3  ;;  %p667_p2 = por %p666_p9, %p665_p7 }
  0x38   : > { %p669_p4 = por %p668_p1, %p667_p2 }
  0x3a   : > { %p670_p6 = pnand %p669_p4, %p663_p5 }
  0x3c   : > { %673 = shalt.err (!%p670_p6)
}
  0x3d   : > { %s674_s7 = scalar_lea.vmem %s890_s22, 128  ;;  %s764_s18 = smov [#allocation2]  }
  0x3e   : > { %p675_p8 = scmp.ne.s32.totalorder %s890_s22, %s674_s7  ;;  %s679_s24 = sshll.u32 %s764_s18, 4  ;;  %s680_s24 = int_to_ptr.vmem [resolvable:$false] %s679_s24 }
  0x3f   : > { %s681_s25 = scalar_lea.vmem %s680_s24, 256  ;;  %p682_p3 = scmp.lt.s32.totalorder %s890_s22, %s680_s24 }
  0x40   : > { %p677_p10 = pnand %p675_p8, %p661_p0  ;;  %p683_p7 = scmp.lt.s32.totalorder %s681_s25, %s674_s7 }
  0x42   : > { %p678_p13 = pneg %p677_p10  ;;  %p684_p9 = por %p683_p7, %p682_p3 }
  0x44   : > { %p685_p2 = pnand %p684_p9, %p678_p13 }
  0x46   : > { %688 = shalt.err (!%p685_p2)
}
  0x47   : > { %572 = dma.hbm_to_vmem [thread:$0]  (!%p886_p11), %s884_s27, 128, %s890_s22, %s124_s28  }
  0x48   : > { %p1005_p5 = scmp.ne.s32.totalorder %s1000_s17, 0 }
  0x49   : > { %s920_s20 = sand.u32 (!%p1005_p5), 1, %s751_s10   ;;  %p1006_p0 = scmp.ne.s32.totalorder (!%p1005_p5), %s998_s15, 0 }
  0x4a   : > { %143 = sbr.rel (%p1005_p5) target bundleno = 1071 (0x42f), region = 28  ;;  %s514_s26 = sshll.u32 (!%p1005_p5), %s920_s20, 3 }
  0x4b   : > { %s146_s19 = scalar_lea.sflag (!%p1005_p5), [#allocation3], %s920_s20  ;;  %s149_s29 = scalar_lea.vmem (!%p1005_p5), [#allocation2], %s514_s26 }
  0x51   : > { %734 = dma.done.wait (%p1006_p0), %s146_s19, 128  }
  0x52   : > { %736 = vsyncadd (%p1006_p0), %s146_s19, 4294967168  ;;  %p1007_p11 = scmp.eq.s32.totalorder %s805_s13, 0 }
  0x54   : > { %738 = dma.done.wait (%p1007_p11), [#allocation6], 768   ;;  %p1008_p1 = pmov %p1007_p11 }
  0x55   : > { %v765_v0 = vmov 0   ;;  %v619_v1 = vld [vmem:[#allocation5 + $0x4] ss:$12 sps:$4 sm:$0xff]   ;;  %v621_v2 = vld [vmem:[#allocation5] ss:$12 sps:$4 sm:$0xff]   ;;  %vm217_vm0 = vcmask 261120   ;;  %v345_v17 = vlaneseq }
  0x56   : > { %740 = vsyncadd (%p1008_p1), [#allocation6], 4294966528  ;;  %253 = vmatprep.mubr.bf16.mxu0 %v765_v0  ;;  %221 = vmatprep.subr.bf16.mxu0 %v619_v1  ;;  %v622_v3 = vld [vmem:[#allocation5 + $0x1c] ss:$12 sps:$4 sm:$0xff]   ;;  %v624_v4 = vld [vmem:[#allocation5 + $0x18] ss:$12 sps:$4 sm:$0xff]  }
  0x57   : > { %v175_v5 = vld [vmem:[%s149_s29] sm:$0xff]  ;;  %222 = vmatpush1.bf16.msra.mxu0 %v621_v2  ;;  %v766_v7 = vmov 0.0   ;;  %vm767_vm1 = vmmov 0   ;;  %v626_v16 = vld [vmem:[#allocation5 + $0x20] ss:$12 sps:$4 sm:$0xff]   ;;  %v346_v18 = vshrl.u32 %v345_v17, 7 }
  0x58   : > { %223 = vmatprep.subr.bf16.mxu0 %v622_v3  ;;  %v176_v6 = vpack.c.bf16 %v175_v5, %v175_v5  ;;  %537 = vmatprep.subr.bf16.mxu1 %v766_v7  ;;  %v625_v15 = vld [vmem:[#allocation5 + $0x8] ss:$12 sps:$4 sm:$0xff]   ;;  %v348_v19 = vand.u32 127, %v345_v17  ;;  %vm351_vm3 = vcmask 64512   ;;  %vm368_vm4 = vcmask 1043456   ;;  %s173_s15 = scalar_lea.vmem [#allocation7], %s514_s26 }
  0x59   : > { %541 = vmatprep.mubr.msk.bf16.mxu1 %vm767_vm1, %v766_v7  ;;  %538 = vmatpush3.bf16.msra.mxu1 %v625_v15  ;;  %s427_s17 = sshll.u32 %s173_s15, 4  ;;  %s527_s27 = sshll.u32 %s805_s13, 7  ;;  %s945_s17 = int_to_ptr.vmem [resolvable:$true] %s427_s17 }
  0x5a   : > { %539 = vmatprep.subr.bf16.mxu1 %v766_v7  ;;  %vm349_vm2 = vcmp.le.s32.totalorder %v348_v19, %v346_v18  ;;  %s950_s28 = scalar_lea.hbm %s994_s2, %s527_s27  ;;  %s414_s30 = scalar_lea.sflag [#allocation4], %s920_s20 }
  0x5b   : > { %224 = vmatpush1.bf16.msra.mxu0 %v624_v4  ;;  %s689_s3 = scalar_lea.vmem %s945_s17, 128  ;;  %s768_s13 = smov [#allocation7]  }
  0x5c   : > { %545 = vmatprep.subr.bf16.mxu0 %v766_v7  ;;  %p690_p4 = scmp.ne.s32.totalorder %s945_s17, %s689_s3  ;;  %s693_s4 = sshll.u32 %s768_s13, 4  ;;  %s694_s4 = int_to_ptr.vmem [resolvable:$false] %s693_s4 }
  0x5d   : > { %540 = vmatpush3.bf16.msra.mxu1 %v626_v16  ;;  %s695_s5 = scalar_lea.vmem %s694_s4, 256  ;;  %p696_p10 = scmp.lt.s32.totalorder %s945_s17, %s694_s4 }
  0x5e   : > { %523 = vmatmul.mubr.msk.bf16.vlgmr.msra.gmra.mrb[0].mxu0 %vm217_vm0, %v176_v6  ;;  %551 = vmatprep.subr.bf16.mxu1 %v766_v7  ;;  %p691_p6 = pnand %p690_p4, %p875_p12  ;;  %p697_p13 = scmp.lt.s32.totalorder %s695_s5, %s689_s3 }
  0x5f   : > { %547 = vmatprep.mubr.msk.bf16.mxu0 %vm767_vm1, %v766_v7 }
  0x60   : > { %542 = vmatmul.mubr.msk.bf16.vlgmr.msra.gmra.mrb[0].mxu1 %vm217_vm0, %v176_v6  ;;  %p692_p8 = pneg %p691_p6  ;;  %p698_p3 = por %p697_p13, %p696_p10 }
  0x61   : > { %553 = vmatprep.mubr.msk.bf16.mxu1 %vm767_vm1, %v766_v7 }
  0x62   : > { %p699_p7 = pnand %p698_p3, %p692_p8 }
 0x131   : > { %v255_v8 = vpop.f32.mrb[0].mxu0 }
 0x132   : > { %v304_v9 = vpack.c.bf16 %v255_v8, %v255_v8  ;;  %v257_v10 = vpop.f32.mrb[1].mxu0 }
 0x133   : > { %v259_v11 = vpop.f32.mrb[2].mxu0  ;;  %v302_v13 = vmul.f32 0.25, %v257_v10  ;;  %v296_v31 = vpop.f32.mrb[0].mxu1 }
 0x134   : > { %v260_v12 = vpop.f32.mrb[3].mxu0  ;;  %546 = vmatpush3.bf16.xpose.msra.mxu0 %v304_v9  ;;  %v543_v32 = vpop.f32.mrb[1].mxu1  ;;  %v364_v35 = vpack.c.bf16 %v296_v31, %v296_v31 }
 0x135   : > { %v303_v14 = vpack.c.bf16 %v302_v13, %v302_v13  ;;  %v299_v33 = vpop.f32.mrb[2].mxu1 }
 0x136   : > { %v544_v34 = vpop.f32.mrb[3].mxu1  ;;  %v370_v36 = vsel %vm368_vm4, %v364_v35, 0 }
 0x137   : > { %552 = vmatpush3.bf16.msra.mxu1 %v370_v36 }
 0x13b   : > { %548 = vmatmul.mubr.bf16.vlgmr.msra.gmra.mrb[4].mxu0 %v303_v14 }
 0x20e   : > { %v339_v20 = vpop.f32.mrb[4].mxu0 }
 0x20f   : > { %v350_v21 = vsel %vm349_vm2, %v339_v20, -inf  ;;  %v549_v22 = vpop.f32.mrb[5].mxu0 }
 0x210   : > { %v342_v23 = vpop.f32.mrb[6].mxu0  ;;  %v352_v24 = vsel %vm351_vm3, %v350_v21, -inf }
 0x211   : > { %353 = vmax.xlane.f32.xlu0 %v352_v24  ;;  %v550_v25 = vpop.f32.mrb[7].mxu0 }
 0x29e   : > { %v354_v26 = vpop.xlane.xlu0 %353 }
 0x29f   : > { %v355_v27 = vsub.f32 %v350_v21, %v354_v26 }
 0x2a1   : > { %v356_v28 = vmul.f32 1.442695, %v355_v27 }
 0x2a3   : > { %627 = vpow2.f32 %v356_v28 }
 0x2ad   : > { %v628_v29 = vpop.eup %627 }
 0x2ae   : > { %v358_v30 = vsel %vm351_vm3, %v628_v29, 0.0 }
 0x2af   : > { %359 = vadd.xlane.f32.xlu0 %v358_v30 }
 0x33c   : > { %v360_v37 = vpop.xlane.xlu0 %359 }
 0x33d   : > { %629 = vrcp.f32 %v360_v37 }
 0x347   : > { %v630_v38 = vpop.eup %629 }
 0x348   : > { %v362_v39 = vmul.f32 %v630_v38, %v628_v29 }
 0x34a   : > { %v363_v40 = vpack.c.bf16 %v362_v39, %v362_v39 }
 0x34c   : > { %554 = vmatmul.mubr.msk.bf16.vlgmr.msra.gmra.mrb[4].mxu1 %vm351_vm3, %v363_v40 }
 0x41f   : > { %v406_v41 = vpop.f32.mrb[4].mxu1 }
 0x420   : > { %412 = vst [vmem:[%s173_s15] sm:$0xff] %v406_v41  ;;  %v555_v42 = vpop.f32.mrb[5].mxu1 }
 0x421   : > { %v409_v43 = vpop.f32.mrb[6].mxu1 }
 0x422   : > { %702 = shalt.err (!%p699_p7)
}
 0x423   : > { %s703_s6 = scalar_lea.hbm %s950_s28, 128  ;;  %s707_s24 = scalar_lea.hbm %s994_s2, 256 }
 0x424   : > { %p704_p9 = scmp.ne.s32.totalorder %s950_s28, %s703_s6  ;;  %p708_p0 = scmp.lt.u32.totalorder %s950_s28, %s994_s2 }
 0x425   : > { %p709_p11 = scmp.lt.u32.totalorder %s707_s24, %s703_s6  ;;  %p711_p4 = scmp.lt.u32.totalorder %s703_s6, %s950_s28 }
 0x426   : > { %p705_p2 = pnand %p704_p9, %p875_p12 }
 0x427   : > { %p710_p1 = por %p709_p11, %p708_p0 }
 0x428   : > { %p706_p5 = pneg %p705_p2 }
 0x429   : > { %p712_p6 = por %p711_p4, %p710_p1 }
 0x42b   : > { %p713_p8 = pnand %p712_p6, %p706_p5 }
 0x42d   : > { %716 = shalt.err (!%p713_p8)
}
 0x42e   : > { %563 = dma.vmem_to_hbm [thread:$0]  (%p875_p12), %s945_s17, 128, %s950_s28, %s414_s30   ;;  %v556_v44 = vpop.f32.mrb[7].mxu1 }
 0x42f PF: > { %s439_s26 = sand.u32 1, %s747_s9   ;;  %p1009_p10 = scmp.ne.s32.totalorder %s999_s16, 0 }
 0x430   : > { %p1010_p13 = scmp.ge.s32.totalorder %s759_s12, 2  ;;  %s440_s19 = scalar_lea.sflag [#allocation4], %s439_s26 }
 0x432   : > { %p574_p3 = pnand %p1010_p13, %p1009_p10 }
 0x434   : > { %742 = dma.done.wait (!%p574_p3), %s440_s19, 128  }
 0x435   : > { %744 = vsyncadd (!%p574_p3), %s440_s19, 4294967168  ;;  %p16_p7 = scmp.ge.s32.totalorder %s840_s21, 4   ;;  %s1011_s9 = smov %s751_s10 }
 0x436   : > { %s1012_s10 = smov %s755_s11  ;;  %s1013_s11 = smov %s871_s8 }
 0x437   : > { %s1014_s12 = smov %s840_s21  ;;  %18 = sbr.rel (!%p16_p7) target bundleno = 6 (0x6), region = 77 }
 0x43e   :  { %445 = vsyncpa [#allocation3], 1 }
 0x43f   :  { %447 = vsyncpa [#allocation3 + $0x1], 1 }
 0x440   :  { %448 = vsyncpa [#allocation6], 1 }
 0x441   :  { %449 = vsyncpa [#allocation4], 1 }
 0x442   :  { %451 = vsyncpa [#allocation4 + $0x1], 1 }

</bundles_post_ra>
